<compile_context>
chip_gen: v6e
topology: v6e:2x2x1
jax: 0.10.0
libtpu: 0.0.40
codegen_flags: <defaults>
</compile_context>

<pallas_src>
import functools

import jax
import jax.numpy as jnp
from jax.experimental import pallas as pl
from jax.experimental.pallas import tpu as pltpu

# Make the pure-JAX reference and the in-kernel f32 matmuls use the same
# (full) f32 matmul precision so the strict correctness check is meaningful.
jax.config.update("jax_default_matmul_precision", "highest")

_VMEM_CAP = 48 * 1024 * 1024          # conservative cap (v7x: 64 MiB physical)
_VMEM_CACHE_BUDGET = 40 * 1024 * 1024 # auto-enable y cache only below this


def _sigmoid(v):
    # Stable: exp() argument is always <= 0, no inf intermediates.
    e = jnp.exp(-jnp.abs(v))
    r = 1.0 / (1.0 + e)
    return jnp.where(v >= 0.0, r, e * r)


def _round_up(a, b):
    return (a + b - 1) // b * b


def _enc_heads(x_ref, w1_ref, b1_ref, w2_ref, b2_ref):
    """fc1 -> sigmoid -> fc2 -> sigmoid for both (fused) heads, f32 result."""
    h = jnp.dot(x_ref[...], w1_ref[...],
                preferred_element_type=jnp.float32) + b1_ref[...]
    h = _sigmoid(h)
    y = jnp.dot(h.astype(w2_ref.dtype), w2_ref[...],
                preferred_element_type=jnp.float32) + b2_ref[...]
    return _sigmoid(y)                                   # (tile_m, 2*nz) f32


def _bn_sample_store(y, sum_vec, sumsq_vec, gamma, beta, eps, out_ref,
                     *, m_true, nz):
    """Fold BN into one affine, tanh the sigma half, reparameterize, store."""
    inv_m = 1.0 / m_true
    mc = sum_vec * inv_m                                  # E[y] - 0.5
    mean = mc + 0.5
    var = sumsq_vec * inv_m - mc * mc                     # biased batch var
    inv_std = jax.lax.rsqrt(var + 1e-5)
    scale = gamma * inv_std
    shift = beta - mean * scale
    yn = y * scale + shift                                # (tile_m, 2*nz)
    mu = yn[:, :nz]
    sigma_hat = jnp.tanh(yn[:, nz:])
    z = mu + jnp.exp(0.5 * sigma_hat) * eps
    out_ref[...] = jnp.concatenate([z, mu, sigma_hat],
                                   axis=-1).astype(out_ref.dtype)


def _sampling_single_pass_kernel(x_ref, w1_ref, b1_ref, w2_ref, b2_ref,
                                 gamma_ref, beta_ref, eps_ref, out_ref,
                                 *, m_true, nz):
    """All rows fit in one tile: one matmul pass, stats + BN + sample fused."""
    y = _enc_heads(x_ref, w1_ref, b1_ref, w2_ref, b2_ref)
    rows = jax.lax.broadcasted_iota(jnp.int32, y.shape, 0)
    yc = jnp.where(rows < m_true, y - 0.5, 0.0)           # mask padded rows
    s = jnp.sum(yc, axis=0, keepdims=True)
    ss = jnp.sum(yc * yc, axis=0, keepdims=True)
    _bn_sample_store(y, s, ss, gamma_ref[...], beta_ref[...], eps_ref[...],
                     out_ref, m_true=m_true, nz=nz)


def _sampling_two_pass_kernel(x_ref, w1_ref, b1_ref, w2_ref, b2_ref,
                              gamma_ref, beta_ref, eps_ref,
                              out_ref, sum_ref, sumsq_ref, ycache_ref,
                              *, m_true, tile_m, nz, cache_y):
    p = pl.program_id(0)   # 0 = stats pass, 1 = normalize + sample pass
    i = pl.program_id(1)   # M-tile index

    @pl.when(p == 0)
    def _stats_pass():
        @pl.when(i == 0)
        def _init():
            sum_ref[...] = jnp.zeros_like(sum_ref)
            sumsq_ref[...] = jnp.zeros_like(sumsq_ref)

        y = _enc_heads(x_ref, w1_ref, b1_ref, w2_ref, b2_ref)
        if cache_y:
            start = pl.multiple_of(i * tile_m, tile_m)
            ycache_ref[pl.ds(start, tile_m), :] = y
        rows = i * tile_m + jax.lax.broadcasted_iota(jnp.int32, y.shape, 0)
        # Center post-sigmoid values at 0.5 before accumulating: keeps the
        # E[yc^2] - E[yc]^2 variance numerically robust in f32.
        yc = jnp.where(rows < m_true, y - 0.5, 0.0)        # mask padded rows
        sum_ref[...] += jnp.sum(yc, axis=0, keepdims=True)
        sumsq_ref[...] += jnp.sum(yc * yc, axis=0, keepdims=True)

    @pl.when(p == 1)
    def _normalize_pass():
        if cache_y:
            start = pl.multiple_of(i * tile_m, tile_m)
            y = ycache_ref[pl.ds(start, tile_m), :]
        else:
            # Fallback for very large M where the y cache exceeds VMEM budget.
            y = _enc_heads(x_ref, w1_ref, b1_ref, w2_ref, b2_ref)
        _bn_sample_store(y, sum_ref[...], sumsq_ref[...],
                         gamma_ref[...], beta_ref[...], eps_ref[...],
                         out_ref, m_true=m_true, nz=nz)


def sampling_temporal_forward(enc_out, params, eps, *, tile_m=4096,
                              compute_dtype=jnp.float32,
                              out_dtype=jnp.float32,
                              use_y_cache=None):
    """Forward of Sampling_Temporal for one task.

    enc_out: (B, N, d_model) f32, eps: (B, N, Nz) f32 standard normal.
    params:  ((w1,b1,w2,b2,gamma,beta)_mu, (w1,b1,w2,b2,gamma,beta)_sigma),
             weights stored as (in, out).
    Returns (z, mu, sigma_hat), each (B, N, Nz) in out_dtype.

    compute_dtype=bf16 halves the x/weight HBM streams and doubles MXU rate;
    it is valid on v5e as well (only the MXU sees bf16; elementwise math is
    f32 everywhere). use_y_cache: None=auto (VMEM budget), or force True/False.
    """
    (w1m, b1m, w2m, b2m, gm, btm), (w1s, b1s, w2s, b2s, gs, bts) = params
    B, N, d_model = enc_out.shape
    n_hid = w1m.shape[1]
    nz = w2m.shape[1]
    M = B * N

    # Fuse the two heads: fc1 side-by-side, fc2 block-diagonal.
    w1 = jnp.concatenate([w1m, w1s], axis=1)                       # (d, 2h)
    b1 = jnp.concatenate([b1m, b1s], axis=1)                       # (1, 2h)
    w2 = jnp.zeros((2 * n_hid, 2 * nz), jnp.float32)
    w2 = w2.at[:n_hid, :nz].set(w2m).at[n_hid:, nz:].set(w2s)      # (2h, 2nz)
    b2 = jnp.concatenate([b2m, b2s], axis=1)                       # (1, 2nz)
    gamma = jnp.concatenate([gm, gs], axis=1)
    beta = jnp.concatenate([btm, bts], axis=1)
    w1c = w1.astype(compute_dtype)
    w2c = w2.astype(compute_dtype)

    cit = jnp.dtype(compute_dtype).itemsize
    oit = jnp.dtype(out_dtype).itemsize

    # Tiling: big tiles amortize per-grid-step overhead; single-pass fast path
    # when everything fits in one tile.
    tile_m = max(8, _round_up(tile_m, 8))
    single_pass = _round_up(M, 8) <= tile_m
    if single_pass:
        tile_m = _round_up(M, 8)
        m_pad, n_tiles = tile_m, 1
    else:
        m_pad = _round_up(M, tile_m)
        n_tiles = m_pad // tile_m

    x2 = enc_out.reshape(M, d_model)
    e2 = eps.reshape(M, nz)
    if m_pad != M:
        x2 = jnp.pad(x2, ((0, m_pad - M), (0, 0)))
        e2 = jnp.pad(e2, ((0, m_pad - M), (0, 0)))
    x2 = x2.astype(compute_dtype)

    # --- VMEM budget (lane dim padded to 128 in VMEM) ----------------------
    def _row_bytes(cols, itemsize):
        return _round_up(cols, 128) * itemsize

    tile_bytes = 2 * tile_m * (_row_bytes(d_model, cit)      # x, double-buf
                               + _row_bytes(nz, 4)           # eps
                               + _row_bytes(3 * nz, oit))    # out
    weight_bytes = 2 * (d_model * _row_bytes(2 * n_hid, cit)
                        + 2 * n_hid * _row_bytes(2 * nz, cit)
                        + 8 * (_row_bytes(2 * n_hid, 4) + 3 * _row_bytes(2 * nz, 4)))

    def vmem_need(cache_rows):
        return (tile_bytes + weight_bytes
                + cache_rows * _row_bytes(2 * nz, 4) + (4 << 20))

    if single_pass:
        cache_y = True                       # irrelevant; no recompute anyway
    elif use_y_cache is None:
        cache_y = vmem_need(m_pad) <= _VMEM_CACHE_BUDGET
    else:
        cache_y = bool(use_y_cache)
    cache_rows = m_pad if (cache_y and not single_pass) else 8
    vmem_limit = int(min(max(vmem_need(cache_rows), 32 << 20), _VMEM_CAP))

    # --- advisory cost estimate --------------------------------------------
    recompute = 0 if (single_pass or cache_y) else 1
    cost = pl.CostEstimate(
        flops=int(2 * m_pad * (d_model * 2 * n_hid + 2 * n_hid * 2 * nz)
                  * (1 + recompute)),
        transcendentals=int(m_pad * ((2 * n_hid + 2 * nz) * (1 + recompute)
                                     + 2 * nz)),
        bytes_accessed=int(m_pad * d_model * cit * (1 + recompute)
                           + m_pad * nz * 4
                           + m_pad * 3 * nz * oit
                           + (w1c.size + w2c.size) * cit
                           + (b1.size + b2.size + gamma.size + beta.size) * 4),
    )

    if single_pass:
        kernel = functools.partial(_sampling_single_pass_kernel,
                                   m_true=M, nz=nz)
        grid_spec = pltpu.PrefetchScalarGridSpec(
            num_scalar_prefetch=0, grid=(1,),
            in_specs=[
                pl.BlockSpec((tile_m, d_model), lambda i: (0, 0)),
                pl.BlockSpec((d_model, 2 * n_hid), lambda i: (0, 0)),
                pl.BlockSpec((1, 2 * n_hid), lambda i: (0, 0)),
                pl.BlockSpec((2 * n_hid, 2 * nz), lambda i: (0, 0)),
                pl.BlockSpec((1, 2 * nz), lambda i: (0, 0)),
                pl.BlockSpec((1, 2 * nz), lambda i: (0, 0)),
                pl.BlockSpec((1, 2 * nz), lambda i: (0, 0)),
                pl.BlockSpec((tile_m, nz), lambda i: (0, 0)),
            ],
            out_specs=pl.BlockSpec((tile_m, 3 * nz), lambda i: (0, 0)),
        )
        dims = ("arbitrary",)
    else:
        kernel = functools.partial(_sampling_two_pass_kernel, m_true=M,
                                   tile_m=tile_m, nz=nz, cache_y=cache_y)
        if cache_y:
            # Pass 1 never reads x: freeze its block index so x is fetched
            # from HBM only once (plus one redundant tile-0 fetch).
            x_map = lambda p, i: ((1 - p) * i, 0)
        else:
            x_map = lambda p, i: (i, 0)
        grid_spec = pltpu.PrefetchScalarGridSpec(
            num_scalar_prefetch=0,
            grid=(2, n_tiles),                      # (pass, M-tile)
            in_specs=[
                pl.BlockSpec((tile_m, d_model), x_map),
                pl.BlockSpec((d_model, 2 * n_hid), lambda p, i: (0, 0)),
                pl.BlockSpec((1, 2 * n_hid), lambda p, i: (0, 0)),
                pl.BlockSpec((2 * n_hid, 2 * nz), lambda p, i: (0, 0)),
                pl.BlockSpec((1, 2 * nz), lambda p, i: (0, 0)),
                pl.BlockSpec((1, 2 * nz), lambda p, i: (0, 0)),
                pl.BlockSpec((1, 2 * nz), lambda p, i: (0, 0)),
                # eps is only consumed in pass 1: keep block 0 resident during
                # pass 0 (p*i == 0) so no per-tile fetch is wasted there.
                pl.BlockSpec((tile_m, nz), lambda p, i: (p * i, 0)),
            ],
            # Same trick for the output: the block index never changes during
            # pass 0, so the (never-written) resident block is not flushed;
            # pass 1 rewrites block 0 before the first block-index change.
            out_specs=pl.BlockSpec((tile_m, 3 * nz), lambda p, i: (p * i, 0)),
            scratch_shapes=[
                pltpu.VMEM((1, 2 * nz), jnp.float32),            # sum
                pltpu.VMEM((1, 2 * nz), jnp.float32),            # sum of sq
                pltpu.VMEM((cache_rows, 2 * nz), jnp.float32),   # y cache
            ],
        )
        # Tile axis stays "arbitrary": the shared stats scratch + pass
        # ordering is a sequential cross-tile dependency.
        dims = ("arbitrary", "arbitrary")

    out = pl.pallas_call(
        kernel,
        out_shape=jax.ShapeDtypeStruct((m_pad, 3 * nz), out_dtype),
        grid_spec=grid_spec,
        compiler_params=pltpu.CompilerParams(
            dimension_semantics=dims,
            vmem_limit_bytes=vmem_limit),
        cost_estimate=cost,
    )(x2, w1c, b1, w2c, b2, gamma, beta, e2)

    out = out[:M]
    z = out[:, :nz].reshape(B, N, nz)
    mu = out[:, nz:2 * nz].reshape(B, N, nz)
    sigma_hat = out[:, 2 * nz:].reshape(B, N, nz)
    return z, mu, sigma_hat


def init_enc_linear_params(key, n_in, n_hid, n_out):
    """Matches init_weights(): xavier_normal_ Linear weights, bias 0.1,
    BatchNorm gamma=1 / beta=0.  Weights stored as (in, out)."""
    k1, k2 = jax.random.split(key)
    std1 = (2.0 / (n_in + n_hid)) ** 0.5
    std2 = (2.0 / (n_hid + n_out)) ** 0.5
    w1 = std1 * jax.random.normal(k1, (n_in, n_hid), dtype=jnp.float32)
    w2 = std2 * jax.random.normal(k2, (n_hid, n_out), dtype=jnp.float32)
    b1 = jnp.full((1, n_hid), 0.1, dtype=jnp.float32)
    b2 = jnp.full((1, n_out), 0.1, dtype=jnp.float32)
    gamma = jnp.ones((1, n_out), dtype=jnp.float32)
    beta = jnp.zeros((1, n_out), dtype=jnp.float32)
    return w1, b1, w2, b2, gamma, beta


def init_sampling_temporal_params(key, d_model, n_hid, nz):
    k_mu, k_sg = jax.random.split(key)
    return (init_enc_linear_params(k_mu, d_model, n_hid, nz),
            init_enc_linear_params(k_sg, d_model, n_hid, nz))


def reference_forward(enc_out, params, eps, compute_dtype=jnp.float32):
    """Pure-JAX reference mirroring the PyTorch forward (and the kernel's
    operand dtype so bf16 mode can be checked against matching numerics)."""
    (w1m, b1m, w2m, b2m, gm, btm), (w1s, b1s, w2s, b2s, gs, bts) = params
    B, N, d = enc_out.shape
    M = B * N
    x = enc_out.reshape(M, d)

    def enc_linear(x, w1, b1, w2, b2, g, be):
        h = jnp.dot(x.astype(compute_dtype), w1.astype(compute_dtype),
                    preferred_element_type=jnp.float32) + b1
        h = _sigmoid(h)
        y = jnp.dot(h.astype(compute_dtype), w2.astype(compute_dtype),
                    preferred_element_type=jnp.float32) + b2
        y = _sigmoid(y)
        mean = y.mean(0, keepdims=True)
        var = ((y - mean) ** 2).mean(0, keepdims=True)  # biased (training BN)
        return g * (y - mean) * jax.lax.rsqrt(var + 1e-5) + be

    mu = enc_linear(x, w1m, b1m, w2m, b2m, gm, btm)
    sigma_hat = jnp.tanh(enc_linear(x, w1s, b1s, w2s, b2s, gs, bts))
    z = mu + jnp.exp(0.5 * sigma_hat) * eps.reshape(M, -1)
    nz = mu.shape[-1]
    return (z.reshape(B, N, nz), mu.reshape(B, N, nz),
            sigma_hat.reshape(B, N, nz))


if __name__ == "__main__":
    # Shapes consistent with the module: d_model=64, n_hid=d_model//2, Nz=16.
    B, N = 2, 8
    d_model, nz = 64, 16
    n_hid = d_model // 2
    num_tasks = 3
    num_of_task = 1

    key = jax.random.PRNGKey(0)
    k_x, k_eps, k_p, k_x2, k_eps2 = jax.random.split(key, 5)
    enc_out = jax.random.normal(k_x, (B, N, d_model), dtype=jnp.float32)
    eps = jax.random.normal(k_eps, (B, N, nz), dtype=jnp.float32)

    task_keys = jax.random.split(k_p, num_tasks)
    all_params = [init_sampling_temporal_params(tk, d_model, n_hid, nz)
                  for tk in task_keys]
    params = all_params[num_of_task]          # ModuleList[num_of_task]

    def check(got, ref, tol):
        for g, r in zip(got, ref):
            err = float(jnp.max(jnp.abs(g - r)))
            assert jnp.allclose(g, r, atol=tol, rtol=tol), err

    # --- 1) small M -> single-pass fast path; strict f32 check --------------
    z, mu, sg = sampling_temporal_forward(enc_out, params, eps,
                                          compute_dtype=jnp.float32)
    jax.block_until_ready((z, mu, sg))
    assert z.shape == (B, N, nz) and mu.shape == (B, N, nz)
    assert sg.shape == (B, N, nz) and z.dtype == jnp.float32
    check((z, mu, sg), reference_forward(enc_out, params, eps, jnp.float32),
          5e-3)

    # --- 2) bf16-operand run (perf config; valid on v5e/v6e/v7x MXUs),
    #        checked against a reference using the same operand casting ------
    zb, mub, sgb = sampling_temporal_forward(enc_out, params, eps,
                                             compute_dtype=jnp.bfloat16)
    jax.block_until_ready((zb, mub, sgb))
    check((zb, mub, sgb),
          reference_forward(enc_out, params, eps, jnp.bfloat16), 5e-2)

    # --- 3) larger M -> two-pass tiled path, with and without the VMEM y
    #        cache (exercises padding/masking and the recompute fallback) ----
    B2, N2 = 16, 65                     # M = 1040 (not a tile multiple)
    enc_out2 = jax.random.normal(k_x2, (B2, N2, d_model), dtype=jnp.float32)
    eps2 = jax.random.normal(k_eps2, (B2, N2, nz), dtype=jnp.float32)
    ref2 = reference_forward(enc_out2, params, eps2, jnp.float32)
    for use_cache in (True, False):
        out2 = sampling_temporal_forward(enc_out2, params, eps2, tile_m=256,
                                         compute_dtype=jnp.float32,
                                         use_y_cache=use_cache)
        jax.block_until_ready(out2)
        check(out2, ref2, 5e-3)

    print("KERNEL_OK")
</pallas_src>

<mosaic_0001>
module attributes {stable_mosaic.version = 11 : i64} {
  func.func @_sampling_single_pass_kernel(%arg0: i32, %arg1: memref<16x64xf32, #tpu.memory_space<vmem>>, %arg2: memref<64x64xf32, #tpu.memory_space<vmem>>, %arg3: memref<1x64xf32, #tpu.memory_space<vmem>>, %arg4: memref<64x32xf32, #tpu.memory_space<vmem>>, %arg5: memref<1x32xf32, #tpu.memory_space<vmem>>, %arg6: memref<1x32xf32, #tpu.memory_space<vmem>>, %arg7: memref<1x32xf32, #tpu.memory_space<vmem>>, %arg8: memref<16x16xf32, #tpu.memory_space<vmem>>, %arg9: memref<16x48xf32, #tpu.memory_space<vmem>>) attributes {dimension_semantics = [#tpu.dimension_semantics<arbitrary>], iteration_bounds = array<i64: 1>, scalar_prefetch = 0 : i64, scratch_operands = 0 : i64, tpu.core_type = #tpu.core_type<tc>, window_params = [{pipeline_mode = #tpu.pipeline_mode<synchronous>, transform_indices = @transform_0, window_bounds = array<i64: 16, 64>}, {pipeline_mode = #tpu.pipeline_mode<synchronous>, transform_indices = @transform_1, window_bounds = array<i64: 64, 64>}, {pipeline_mode = #tpu.pipeline_mode<synchronous>, transform_indices = @transform_2, window_bounds = array<i64: 1, 64>}, {pipeline_mode = #tpu.pipeline_mode<synchronous>, transform_indices = @transform_3, window_bounds = array<i64: 64, 32>}, {pipeline_mode = #tpu.pipeline_mode<synchronous>, transform_indices = @transform_4, window_bounds = array<i64: 1, 32>}, {pipeline_mode = #tpu.pipeline_mode<synchronous>, transform_indices = @transform_5, window_bounds = array<i64: 1, 32>}, {pipeline_mode = #tpu.pipeline_mode<synchronous>, transform_indices = @transform_6, window_bounds = array<i64: 1, 32>}, {pipeline_mode = #tpu.pipeline_mode<synchronous>, transform_indices = @transform_7, window_bounds = array<i64: 16, 16>}, {pipeline_mode = #tpu.pipeline_mode<synchronous>, transform_indices = @transform_8, window_bounds = array<i64: 16, 48>}]} {
    %c0 = arith.constant 0 : index
    %c0_0 = arith.constant 0 : index
    %0 = vector.load %arg1[%c0, %c0_0] : memref<16x64xf32, #tpu.memory_space<vmem>>, vector<16x64xf32>
    %c0_1 = arith.constant 0 : index
    %c0_2 = arith.constant 0 : index
    %1 = vector.load %arg2[%c0_1, %c0_2] : memref<64x64xf32, #tpu.memory_space<vmem>>, vector<64x64xf32>
    %cst = arith.constant dense<0.000000e+00> : vector<16x64xf32>
    %2 = tpu.matmul %0, %1, %cst {dimension_numbers = #tpu.dot_dimension_numbers<[1], [0], [0], [1], [0, 0, 1, 1], [], []>, precision = #tpu.contract_precision<fp32>} : vector<16x64xf32>, vector<64x64xf32>, vector<16x64xf32> -> vector<16x64xf32>
    %c0_3 = arith.constant 0 : index
    %c0_4 = arith.constant 0 : index
    %3 = vector.load %arg3[%c0_3, %c0_4] : memref<1x64xf32, #tpu.memory_space<vmem>>, vector<1x64xf32>
    %4 = vector.broadcast %3 : vector<1x64xf32> to vector<16x64xf32>
    %5 = arith.addf %2, %4 : vector<16x64xf32>
    %6 = math.absf %5 : vector<16x64xf32>
    %cst_5 = arith.constant 0.000000e+00 : f32
    %7 = vector.broadcast %cst_5 : f32 to vector<16x64xf32>
    %8 = arith.subf %7, %6 : vector<16x64xf32>
    %9 = math.exp %8 : vector<16x64xf32>
    %cst_6 = arith.constant 1.000000e+00 : f32
    %10 = vector.broadcast %cst_6 : f32 to vector<16x64xf32>
    %11 = arith.addf %10, %9 : vector<16x64xf32>
    %cst_7 = arith.constant 1.000000e+00 : f32
    %12 = vector.broadcast %cst_7 : f32 to vector<16x64xf32>
    %13 = arith.divf %12, %11 : vector<16x64xf32>
    %cst_8 = arith.constant 0.000000e+00 : f32
    %14 = vector.broadcast %cst_8 : f32 to vector<16x64xf32>
    %15 = arith.cmpf oge, %5, %14 : vector<16x64xf32>
    %16 = arith.mulf %9, %13 : vector<16x64xf32>
    %17 = arith.select %15, %13, %16 : vector<16x64xi1>, vector<16x64xf32>
    %c0_9 = arith.constant 0 : index
    %c0_10 = arith.constant 0 : index
    %18 = vector.load %arg4[%c0_9, %c0_10] : memref<64x32xf32, #tpu.memory_space<vmem>>, vector<64x32xf32>
    %cst_11 = arith.constant dense<0.000000e+00> : vector<16x32xf32>
    %19 = tpu.matmul %17, %18, %cst_11 {dimension_numbers = #tpu.dot_dimension_numbers<[1], [0], [0], [1], [0, 0, 1, 1], [], []>, precision = #tpu.contract_precision<fp32>} : vector<16x64xf32>, vector<64x32xf32>, vector<16x32xf32> -> vector<16x32xf32>
    %c0_12 = arith.constant 0 : index
    %c0_13 = arith.constant 0 : index
    %20 = vector.load %arg5[%c0_12, %c0_13] : memref<1x32xf32, #tpu.memory_space<vmem>>, vector<1x32xf32>
    %21 = vector.broadcast %20 : vector<1x32xf32> to vector<16x32xf32>
    %22 = arith.addf %19, %21 : vector<16x32xf32>
    %23 = math.absf %22 : vector<16x32xf32>
    %cst_14 = arith.constant 0.000000e+00 : f32
    %24 = vector.broadcast %cst_14 : f32 to vector<16x32xf32>
    %25 = arith.subf %24, %23 : vector<16x32xf32>
    %26 = math.exp %25 : vector<16x32xf32>
    %cst_15 = arith.constant 1.000000e+00 : f32
    %27 = vector.broadcast %cst_15 : f32 to vector<16x32xf32>
    %28 = arith.addf %27, %26 : vector<16x32xf32>
    %cst_16 = arith.constant 1.000000e+00 : f32
    %29 = vector.broadcast %cst_16 : f32 to vector<16x32xf32>
    %30 = arith.divf %29, %28 : vector<16x32xf32>
    %cst_17 = arith.constant 0.000000e+00 : f32
    %31 = vector.broadcast %cst_17 : f32 to vector<16x32xf32>
    %32 = arith.cmpf oge, %22, %31 : vector<16x32xf32>
    %33 = arith.mulf %26, %30 : vector<16x32xf32>
    %34 = arith.select %32, %30, %33 : vector<16x32xi1>, vector<16x32xf32>
    %35 = tpu.iota {dimensions = array<i32: 0>} : vector<16x32xi32>
    %c16_i32 = arith.constant 16 : i32
    %36 = vector.broadcast %c16_i32 : i32 to vector<16x32xi32>
    %37 = arith.cmpi slt, %35, %36 : vector<16x32xi32>
    %cst_18 = arith.constant 5.000000e-01 : f32
    %38 = vector.broadcast %cst_18 : f32 to vector<16x32xf32>
    %39 = arith.subf %34, %38 : vector<16x32xf32>
    %cst_19 = arith.constant 0.000000e+00 : f32
    %40 = vector.broadcast %cst_19 : f32 to vector<16x32xf32>
    %41 = arith.select %37, %39, %40 : vector<16x32xi1>, vector<16x32xf32>
    %cst_20 = arith.constant dense<0.000000e+00> : vector<32xf32>
    %42 = vector.multi_reduction <add>, %41, %cst_20 [0] : vector<16x32xf32> to vector<32xf32>
    %43 = vector.shape_cast %42 : vector<32xf32> to vector<1x32xf32>
    %44 = arith.mulf %41, %41 : vector<16x32xf32>
    %cst_21 = arith.constant dense<0.000000e+00> : vector<32xf32>
    %45 = vector.multi_reduction <add>, %44, %cst_21 [0] : vector<16x32xf32> to vector<32xf32>
    %46 = vector.shape_cast %45 : vector<32xf32> to vector<1x32xf32>
    %c0_22 = arith.constant 0 : index
    %c0_23 = arith.constant 0 : index
    %47 = vector.load %arg6[%c0_22, %c0_23] : memref<1x32xf32, #tpu.memory_space<vmem>>, vector<1x32xf32>
    %c0_24 = arith.constant 0 : index
    %c0_25 = arith.constant 0 : index
    %48 = vector.load %arg7[%c0_24, %c0_25] : memref<1x32xf32, #tpu.memory_space<vmem>>, vector<1x32xf32>
    %c0_26 = arith.constant 0 : index
    %c0_27 = arith.constant 0 : index
    %49 = vector.load %arg8[%c0_26, %c0_27] : memref<16x16xf32, #tpu.memory_space<vmem>>, vector<16x16xf32>
    %cst_28 = arith.constant 6.250000e-02 : f32
    %50 = vector.broadcast %cst_28 : f32 to vector<1x32xf32>
    %51 = arith.mulf %43, %50 : vector<1x32xf32>
    %cst_29 = arith.constant 5.000000e-01 : f32
    %52 = vector.broadcast %cst_29 : f32 to vector<1x32xf32>
    %53 = arith.addf %51, %52 : vector<1x32xf32>
    %cst_30 = arith.constant 6.250000e-02 : f32
    %54 = vector.broadcast %cst_30 : f32 to vector<1x32xf32>
    %55 = arith.mulf %46, %54 : vector<1x32xf32>
    %56 = arith.mulf %51, %51 : vector<1x32xf32>
    %57 = arith.subf %55, %56 : vector<1x32xf32>
    %cst_31 = arith.constant 9.99999974E-6 : f32
    %58 = vector.broadcast %cst_31 : f32 to vector<1x32xf32>
    %59 = arith.addf %57, %58 : vector<1x32xf32>
    %60 = math.rsqrt %59 : vector<1x32xf32>
    %61 = arith.mulf %47, %60 : vector<1x32xf32>
    %62 = arith.mulf %53, %61 : vector<1x32xf32>
    %63 = arith.subf %48, %62 : vector<1x32xf32>
    %64 = vector.broadcast %61 : vector<1x32xf32> to vector<16x32xf32>
    %65 = arith.mulf %34, %64 : vector<16x32xf32>
    %66 = vector.broadcast %63 : vector<1x32xf32> to vector<16x32xf32>
    %67 = arith.addf %65, %66 : vector<16x32xf32>
    %68 = vector.extract_strided_slice %67 {offsets = [0, 0], sizes = [16, 16], strides = [1, 1]} : vector<16x32xf32> to vector<16x16xf32>
    %69 = vector.extract_strided_slice %67 {offsets = [0, 16], sizes = [16, 16], strides = [1, 1]} : vector<16x32xf32> to vector<16x16xf32>
    %70 = math.tanh %69 : vector<16x16xf32>
    %cst_32 = arith.constant 5.000000e-01 : f32
    %71 = vector.broadcast %cst_32 : f32 to vector<16x16xf32>
    %72 = arith.mulf %71, %70 : vector<16x16xf32>
    %73 = math.exp %72 : vector<16x16xf32>
    %74 = arith.mulf %73, %49 : vector<16x16xf32>
    %75 = arith.addf %68, %74 : vector<16x16xf32>
    %76 = tpu.concatenate %75, %68, %70 in 1 : vector<16x16xf32>, vector<16x16xf32>, vector<16x16xf32> -> vector<16x48xf32>
    %c0_33 = arith.constant 0 : index
    %c0_34 = arith.constant 0 : index
    %77 = vector.load %arg9[%c0_33, %c0_34] : memref<16x48xf32, #tpu.memory_space<vmem>>, vector<16x48xf32>
    tpu.vector_store %arg9[%c0_33, %c0_34], %76 {strides = array<i32>} : memref<16x48xf32, #tpu.memory_space<vmem>>, vector<16x48xf32>,
    return
  }
  func.func @transform_0(%arg0: i32) -> (i32, i32) {
    %c0_i32 = arith.constant 0 : i32
    %c0_i32_0 = arith.constant 0 : i32
    %c0_i32_1 = arith.constant 0 : i32
    return %c0_i32, %c0_i32_0 : i32, i32
  }
  func.func @transform_1(%arg0: i32) -> (i32, i32) {
    %c0_i32 = arith.constant 0 : i32
    %c0_i32_0 = arith.constant 0 : i32
    %c0_i32_1 = arith.constant 0 : i32
    return %c0_i32, %c0_i32_0 : i32, i32
  }
  func.func @transform_2(%arg0: i32) -> (i32, i32) {
    %c0_i32 = arith.constant 0 : i32
    %c0_i32_0 = arith.constant 0 : i32
    %c0_i32_1 = arith.constant 0 : i32
    return %c0_i32, %c0_i32_0 : i32, i32
  }
  func.func @transform_3(%arg0: i32) -> (i32, i32) {
    %c0_i32 = arith.constant 0 : i32
    %c0_i32_0 = arith.constant 0 : i32
    %c0_i32_1 = arith.constant 0 : i32
    return %c0_i32, %c0_i32_0 : i32, i32
  }
  func.func @transform_4(%arg0: i32) -> (i32, i32) {
    %c0_i32 = arith.constant 0 : i32
    %c0_i32_0 = arith.constant 0 : i32
    %c0_i32_1 = arith.constant 0 : i32
    return %c0_i32, %c0_i32_0 : i32, i32
  }
  func.func @transform_5(%arg0: i32) -> (i32, i32) {
    %c0_i32 = arith.constant 0 : i32
    %c0_i32_0 = arith.constant 0 : i32
    %c0_i32_1 = arith.constant 0 : i32
    return %c0_i32, %c0_i32_0 : i32, i32
  }
  func.func @transform_6(%arg0: i32) -> (i32, i32) {
    %c0_i32 = arith.constant 0 : i32
    %c0_i32_0 = arith.constant 0 : i32
    %c0_i32_1 = arith.constant 0 : i32
    return %c0_i32, %c0_i32_0 : i32, i32
  }
  func.func @transform_7(%arg0: i32) -> (i32, i32) {
    %c0_i32 = arith.constant 0 : i32
    %c0_i32_0 = arith.constant 0 : i32
    %c0_i32_1 = arith.constant 0 : i32
    return %c0_i32, %c0_i32_0 : i32, i32
  }
  func.func @transform_8(%arg0: i32) -> (i32, i32) {
    %c0_i32 = arith.constant 0 : i32
    %c0_i32_0 = arith.constant 0 : i32
    %c0_i32_1 = arith.constant 0 : i32
    return %c0_i32, %c0_i32_0 : i32, i32
  }
}

</mosaic_0001>

<bundles_post_ra>
// kernel: tpu_custom_call.1
= control target key start
LH: loop header
LB: loop body
LE: loop exit
PB: predicated region body
PF: predicated region fallthrough
CT: control target
= control target key end

     0   :  { %vm47_vm0 = vcmask 523264   ;;  %s2293_s0 = inlined_call_operand.vmem [shape: f32[16,64], index: 0, kind: input, shape index: {}]   ;;  %s2294_s1 = inlined_call_operand.vmem [shape: f32[64,64], index: 1, kind: input, shape index: {}]   ;;  %s2295_s2 = inlined_call_operand.vmem [shape: f32[1,64], index: 2, kind: input, shape index: {}]   ;;  %s2296_s3 = inlined_call_operand.vmem [shape: f32[64,32], index: 3, kind: input, shape index: {}]   ;;  %s2297_s4 = inlined_call_operand.vmem [shape: f32[1,32], index: 4, kind: input, shape index: {}]   ;;  %s2298_s5 = inlined_call_operand.vmem [shape: f32[1,32], index: 5, kind: input, shape index: {}]   ;;  %s2299_s6 = inlined_call_operand.vmem [shape: f32[1,32], index: 6, kind: input, shape index: {}]   ;;  %s2300_s7 = inlined_call_operand.vmem [shape: f32[16,16], index: 7, kind: input, shape index: {}]   ;;  %s2301_s8 = inlined_call_operand.hbm [shape: f32[16,48], index: 8, kind: output, shape index: {}]  }
   0x1   :  { %v39_v0 = vld [vmem:[%s2294_s1 + $0x38] sm:$0xff]  ;;  %v38_v1 = vld [vmem:[%s2294_s1 + $0x30] sm:$0xff]  ;;  %v37_v2 = vld [vmem:[%s2294_s1 + $0x28] sm:$0xff] }
   0x2   :  { %v1867_v3 = vand.u32 4294901760, %v39_v0  ;;  %v1869_v4 = vand.u32 4294901760, %v38_v1  ;;  %v1871_v5 = vand.u32 4294901760, %v37_v2  ;;  %v36_v6 = vld [vmem:[%s2294_s1 + $0x20] sm:$0xff]  ;;  %v35_v7 = vld [vmem:[%s2294_s1 + $0x18] sm:$0xff]  ;;  %v34_v8 = vld [vmem:[%s2294_s1 + $0x10] sm:$0xff] }
   0x3   :  { %v1882_v9 = vand.u32 4294901760, %v36_v6  ;;  %v1884_v10 = vand.u32 4294901760, %v35_v7  ;;  %v1886_v11 = vand.u32 4294901760, %v34_v8  ;;  %v33_v12 = vld [vmem:[%s2294_s1 + $0x8] sm:$0xff]  ;;  %v32_v13 = vld [vmem:[%s2294_s1] sm:$0xff] }
   0x4   :  { %v30_v14 = vld [vmem:[%s2293_s0] sm:$0xff]  ;;  %1527 = vmatprep.subr.mxu0 %v1867_v3  ;;  %v1899_v15 = vsub.f32 %v39_v0, %v1867_v3  ;;  %v1902_v16 = vsub.f32 %v38_v1, %v1869_v4  ;;  %v1904_v17 = vand.u32 4294901760, %v33_v12  ;;  %v1907_v18 = vsub.f32 %v37_v2, %v1871_v5  ;;  %v31_v19 = vld [vmem:[%s2293_s0 + $0x8] sm:$0xff] }
   0x5   :  { %13 = vsyncpa [#allocation3], 0  ;;  %1528 = vmatpush3.msra.mxu0 %v1867_v3  ;;  %v1913_v20 = vand.u32 4294901760, %v32_v13  ;;  %v1916_v21 = vsub.f32 %v36_v6, %v1882_v9  ;;  %v49_v22 = vsel %vm47_vm0, %v30_v14, 0  ;;  %v1920_v23 = vsub.f32 %v35_v7, %v1884_v10  ;;  %v661_v62 = vld [vmem:[%s2296_s3 + $0x38] sm:$0xff]  ;;  %v660_v0 = vld [vmem:[%s2296_s3 + $0x30] sm:$0xff] }
   0x6   :  { %1529 = vmatprep.subr.mxu0 %v1869_v4  ;;  %v1924_v24 = vand.u32 4294901760, %v1899_v15  ;;  %v1927_v25 = vand.u32 4294901760, %v1902_v16  ;;  %v1930_v26 = vand.u32 4294901760, %v1907_v18  ;;  %v1932_v27 = vand.u32 4294901760, %v49_v22  ;;  %v658_v7 = vld [vmem:[%s2296_s3 + $0x20] sm:$0xff]  ;;  %s1808_s19 = smov 16  }
   0x7   :  { %1530 = vmatpush3.msra.mxu0 %v1869_v4  ;;  %v1936_v28 = vand.u32 4294901760, %v1916_v21  ;;  %v1939_v29 = vand.u32 4294901760, %v1920_v23  ;;  %v52_v30 = vsel %vm47_vm0, %v31_v19, 0  ;;  %v1943_v31 = vsub.f32 %v34_v8, %v1886_v11 }
   0x8   :  { %1531 = vmatprep.subr.mxu0 %v1871_v5  ;;  %v167_v32 = vsub.f32 %v1899_v15, %v1924_v24  ;;  %v174_v33 = vsub.f32 %v1902_v16, %v1927_v25  ;;  %v181_v34 = vsub.f32 %v1907_v18, %v1930_v26  ;;  %v1953_v35 = vsub.f32 %v49_v22, %v1932_v27 }
   0x9   :  { %1532 = vmatpush3.msra.mxu0 %v1871_v5  ;;  %v1956_v36 = vand.u32 4294901760, %v52_v30  ;;  %1562 = vmatprep.mubr.f32.mxu1 %v1932_v27  ;;  %v188_v39 = vsub.f32 %v1916_v21, %v1936_v28  ;;  %v195_v41 = vsub.f32 %v1920_v23, %v1939_v29  ;;  %v1970_v43 = vand.u32 4294901760, %v1943_v31 }
   0xa   :  { %1533 = vmatprep.subr.mxu0 %v1882_v9  ;;  %v168_v37 = vand.u32 4294901760, %v167_v32  ;;  %v175_v38 = vand.u32 4294901760, %v174_v33  ;;  %v129_v40 = vand.u32 4294901760, %v1953_v35  ;;  %v182_v44 = vand.u32 4294901760, %v181_v34 }
   0xb   :  { %1534 = vmatpush3.msra.mxu0 %v1882_v9  ;;  %v1967_v42 = vsub.f32 %v52_v30, %v1956_v36  ;;  %v207_v46 = vsub.f32 %v33_v12, %v1904_v17  ;;  %v214_v47 = vsub.f32 %v32_v13, %v1913_v20  ;;  %v189_v49 = vand.u32 4294901760, %v188_v39  ;;  %v657_v12 = vld [vmem:[%s2296_s3 + $0x18] sm:$0xff]  ;;  %v654_v30 = vld [vmem:[%s2296_s3] sm:$0xff] }
   0xc   :  { %1535 = vmatprep.subr.mxu0 %v1884_v10  ;;  %1546 = vmatprep.subr.mxu1 %v168_v37  ;;  %v130_v45 = vsub.f32 %v1953_v35, %v129_v40  ;;  %v202_v52 = vsub.f32 %v1943_v31, %v1970_v43  ;;  %v196_v55 = vand.u32 4294901760, %v195_v41  ;;  %v2071_v63 = vand.u32 4294901760, %v661_v62 }
   0xd   :  { %1536 = vmatpush3.msra.mxu0 %v1884_v10  ;;  %1547 = vmatpush3.msra.mxu1 %v168_v37  ;;  %v139_v48 = vand.u32 4294901760, %v1967_v42  ;;  %v1981_v50 = vand.u32 4294901760, %v207_v46  ;;  %v1989_v53 = vand.u32 4294901760, %v214_v47  ;;  %v2079_v2 = vand.u32 4294901760, %v660_v0 }
   0xe   :  { %1537 = vmatprep.subr.mxu0 %v1886_v11  ;;  %1548 = vmatprep.subr.mxu1 %v175_v38  ;;  %v131_v54 = vand.u32 4294901760, %v130_v45  ;;  %v203_v58 = vand.u32 4294901760, %v202_v52  ;;  %v2077_v1 = vsub.f32 %v661_v62, %v2071_v63  ;;  %v2164_v34 = vand.u32 4294901760, %v654_v30 }
   0xf   :  { %1538 = vmatpush3.msra.mxu0 %v1886_v11  ;;  %1549 = vmatpush3.msra.mxu1 %v175_v38  ;;  %v140_v51 = vsub.f32 %v1967_v42, %v139_v48  ;;  %v209_v57 = vsub.f32 %v207_v46, %v1981_v50  ;;  %v216_v59 = vsub.f32 %v214_v47, %v1989_v53  ;;  %vm1284_vm5 = vcmask 261120  }
  0x10   :  { %1539 = vmatprep.subr.mxu0 %v1904_v17  ;;  %1550 = vmatprep.subr.mxu1 %v182_v44  ;;  %v2176_v38 = vsub.f32 %v654_v30, %v2164_v34  ;;  %vm1379_vm6 = vcmask 130048   ;;  %vm1384_vm7 = vcmask 392192  }
  0x11   :  { %1540 = vmatpush3.msra.mxu0 %v1904_v17  ;;  %1551 = vmatpush3.msra.mxu1 %v182_v44  ;;  %v141_v56 = vand.u32 4294901760, %v140_v51  ;;  %v210_v60 = vand.u32 4294901760, %v209_v57  ;;  %v217_v61 = vand.u32 4294901760, %v216_v59 }
  0x12   :  { %1541 = vmatprep.subr.mxu0 %v1913_v20  ;;  %1552 = vmatprep.subr.mxu1 %v189_v49 }
  0x13   :  { %1542 = vmatpush3.msra.mxu0 %v1913_v20  ;;  %1553 = vmatpush3.msra.mxu1 %v189_v49 }
  0x14   :  { %1543 = vmatprep.mubr.f32.mxu0 %v131_v54  ;;  %1554 = vmatprep.subr.mxu1 %v196_v55 }
  0x15   :  { %1565 = vmatprep.subr.mxu0 %v1899_v15  ;;  %1544 = vmatmul.mubr.f32.vlgmr.msra.gmra.mxu0 %v141_v56 }
  0x16   :  { %1555 = vmatpush3.msra.mxu1 %v196_v55  ;;  %1566 = vmatpush3.msra.mxu0 %v1899_v15 }
  0x17   :  { %1556 = vmatprep.subr.mxu1 %v203_v58  ;;  %1567 = vmatprep.subr.mxu0 %v1902_v16 }
  0x18   :  { %1557 = vmatpush3.msra.mxu1 %v203_v58  ;;  %1568 = vmatpush3.msra.mxu0 %v1902_v16 }
  0x19   :  { %1558 = vmatprep.subr.mxu1 %v210_v60  ;;  %1569 = vmatprep.subr.mxu0 %v1907_v18 }
  0x1a   :  { %1559 = vmatpush3.msra.mxu1 %v210_v60  ;;  %1570 = vmatpush3.msra.mxu0 %v1907_v18  ;;  %v656_v18 = vld [vmem:[%s2296_s3 + $0x10] sm:$0xff] }
  0x1b   :  { %1560 = vmatprep.subr.mxu1 %v217_v61  ;;  %1571 = vmatprep.subr.mxu0 %v1916_v21  ;;  %v2134_v22 = vand.u32 4294901760, %v656_v18 }
  0x1c   :  { %1561 = vmatpush3.msra.mxu1 %v217_v61  ;;  %1572 = vmatpush3.msra.mxu0 %v1916_v21 }
  0x1d   :  { %1563 = vmatmul.mubr.f32.vlgmr.msra.gmra.mxu1 %v1956_v36  ;;  %1573 = vmatprep.subr.mxu0 %v1920_v23 }
  0x1e   :  { %1584 = vmatprep.subr.mxu1 %v1867_v3  ;;  %1574 = vmatpush3.msra.mxu0 %v1920_v23 }
  0x1f   :  { %1585 = vmatpush3.msra.mxu1 %v1867_v3  ;;  %1575 = vmatprep.subr.mxu0 %v1943_v31 }
  0x20   :  { %1586 = vmatprep.subr.mxu1 %v1869_v4  ;;  %1576 = vmatpush3.msra.mxu0 %v1943_v31 }
  0x21   :  { %1587 = vmatpush3.msra.mxu1 %v1869_v4  ;;  %1577 = vmatprep.subr.mxu0 %v207_v46 }
  0x22   :  { %1588 = vmatprep.subr.mxu1 %v1871_v5  ;;  %1578 = vmatpush3.msra.mxu0 %v207_v46 }
  0x23   :  { %1589 = vmatpush3.msra.mxu1 %v1871_v5  ;;  %1579 = vmatprep.subr.mxu0 %v214_v47 }
  0x24   :  { %1590 = vmatprep.subr.mxu1 %v1882_v9  ;;  %1580 = vmatpush3.msra.mxu0 %v214_v47  ;;  %v1403_v47 = vld [vmem:[%s2295_s2] ss:$0 sm:$0xff] }
  0x25   :  { %1581 = vmatprep.mubr.f32.mxu0 %v1953_v35  ;;  %1591 = vmatpush3.msra.mxu1 %v1882_v9 }
  0x26   :  { %1582 = vmatmul.mubr.f32.vlgmr.msra.gmra.mxu0 %v1967_v42  ;;  %1592 = vmatprep.subr.mxu1 %v1884_v10  ;;  %v2183_v42 = vand.u32 4294901760, %v2176_v38 }
  0x27   :  { %1603 = vmatprep.subr.mxu0 %v1924_v24  ;;  %1593 = vmatpush3.msra.mxu1 %v1884_v10 }
  0x28   :  { %1604 = vmatpush3.msra.mxu0 %v1924_v24  ;;  %1594 = vmatprep.subr.mxu1 %v1886_v11  ;;  %v655_v24 = vld [vmem:[%s2296_s3 + $0x8] sm:$0xff]  ;;  %v837_v44 = vsub.f32 %v2176_v38, %v2183_v42 }
  0x29   :  { %1605 = vmatprep.subr.mxu0 %v1927_v25  ;;  %1595 = vmatpush3.msra.mxu1 %v1886_v11 }
  0x2a   :  { %1606 = vmatpush3.msra.mxu0 %v1927_v25  ;;  %1596 = vmatprep.subr.mxu1 %v1904_v17  ;;  %v838_v45 = vand.u32 4294901760, %v837_v44 }
  0x2b   :  { %1607 = vmatprep.subr.mxu0 %v1930_v26  ;;  %1597 = vmatpush3.msra.mxu1 %v1904_v17 }
  0x2c   :  { %1608 = vmatpush3.msra.mxu0 %v1930_v26  ;;  %1598 = vmatprep.subr.mxu1 %v1913_v20 }
  0x2d   :  { %1609 = vmatprep.subr.mxu0 %v1936_v28  ;;  %1599 = vmatpush3.msra.mxu1 %v1913_v20 }
  0x2e   :  { %1600 = vmatprep.mubr.f32.mxu1 %v129_v40  ;;  %1610 = vmatpush3.msra.mxu0 %v1936_v28  ;;  %v2148_v28 = vand.u32 4294901760, %v655_v24 }
  0x2f   :  { %1601 = vmatmul.mubr.f32.vlgmr.msra.gmra.mxu1 %v139_v48  ;;  %1611 = vmatprep.subr.mxu0 %v1939_v29 }
  0x30   :  { %1622 = vmatprep.subr.mxu1 %v1867_v3  ;;  %1612 = vmatpush3.msra.mxu0 %v1939_v29  ;;  %v2162_v33 = vsub.f32 %v655_v24, %v2148_v28 }
  0x31   :  { %1623 = vmatpush3.msra.mxu1 %v1867_v3  ;;  %1613 = vmatprep.subr.mxu0 %v1970_v43  ;;  %v659_v3 = vld [vmem:[%s2296_s3 + $0x28] sm:$0xff] }
  0x32   :  { %1624 = vmatprep.subr.mxu1 %v1869_v4  ;;  %1614 = vmatpush3.msra.mxu0 %v1970_v43  ;;  %v2092_v6 = vand.u32 4294901760, %v659_v3  ;;  %v2173_v37 = vand.u32 4294901760, %v2162_v33 }
  0x33   :  { %1625 = vmatpush3.msra.mxu1 %v1869_v4  ;;  %1615 = vmatprep.subr.mxu0 %v1981_v50  ;;  %v2087_v4 = vand.u32 4294901760, %v2077_v1 }
  0x34   :  { %1626 = vmatprep.subr.mxu1 %v1871_v5  ;;  %1616 = vmatpush3.msra.mxu0 %v1981_v50  ;;  %v830_v41 = vsub.f32 %v2162_v33, %v2173_v37 }
  0x35   :  { %1627 = vmatpush3.msra.mxu1 %v1871_v5  ;;  %1617 = vmatprep.subr.mxu0 %v1989_v53  ;;  %v2090_v5 = vsub.f32 %v660_v0, %v2079_v2  ;;  %v788_v8 = vsub.f32 %v2077_v1, %v2087_v4 }
  0x36   :  { %1628 = vmatprep.subr.mxu1 %v1882_v9  ;;  %1618 = vmatpush3.msra.mxu0 %v1989_v53  ;;  %v831_v43 = vand.u32 4294901760, %v830_v41 }
  0x37   :  { %1619 = vmatprep.mubr.f32.mxu0 %v1932_v27  ;;  %1629 = vmatpush3.msra.mxu1 %v1882_v9  ;;  %v2102_v9 = vand.u32 4294901760, %v2090_v5  ;;  %v789_v13 = vand.u32 4294901760, %v788_v8 }
  0x38   :  { %1620 = vmatmul.mubr.f32.vlgmr.msra.gmra.mxu0 %v1956_v36  ;;  %1630 = vmatprep.subr.mxu1 %v1884_v10 }
  0x39   :  { %1631 = vmatpush3.msra.mxu1 %v1884_v10  ;;  %1638 = vmatprep.mubr.f32.mxu1 %v1932_v27  ;;  %v2105_v10 = vsub.f32 %v659_v3, %v2092_v6  ;;  %v795_v14 = vsub.f32 %v2090_v5, %v2102_v9  ;;  %v2146_v27 = vsub.f32 %v656_v18, %v2134_v22 }
  0x3a   :  { %1632 = vmatprep.subr.mxu1 %v1886_v11  ;;  %1641 = vmatprep.subr.mxu0 %v2071_v63 }
  0x3b   :  { %1633 = vmatpush3.msra.mxu1 %v1886_v11  ;;  %1642 = vmatpush3.msra.mxu0 %v2071_v63  ;;  %v2107_v11 = vand.u32 4294901760, %v658_v7  ;;  %v2117_v15 = vand.u32 4294901760, %v2105_v10  ;;  %v796_v19 = vand.u32 4294901760, %v795_v14  ;;  %v2159_v32 = vand.u32 4294901760, %v2146_v27 }
  0x3c   :  { %1634 = vmatprep.subr.mxu1 %v1904_v17  ;;  %1643 = vmatprep.subr.mxu0 %v2079_v2 }
  0x3d   :  { %1635 = vmatpush3.msra.mxu1 %v1904_v17  ;;  %1644 = vmatpush3.msra.mxu0 %v2079_v2  ;;  %v2120_v16 = vsub.f32 %v658_v7, %v2107_v11  ;;  %v2123_v17 = vand.u32 4294901760, %v657_v12 }
  0x3e   :  { %1636 = vmatprep.subr.mxu1 %v1913_v20  ;;  %1645 = vmatprep.subr.mxu0 %v2092_v6 }
  0x3f   :  { %1637 = vmatpush3.msra.mxu1 %v1913_v20  ;;  %1646 = vmatpush3.msra.mxu0 %v2092_v6  ;;  %v802_v20 = vsub.f32 %v2105_v10, %v2117_v15  ;;  %v2132_v21 = vand.u32 4294901760, %v2120_v16  ;;  %v2137_v23 = vsub.f32 %v657_v12, %v2123_v17 }
  0x40   :  { %1639 = vmatmul.mubr.f32.vlgmr.msra.gmra.mxu1 %v1956_v36  ;;  %1647 = vmatprep.subr.mxu0 %v2107_v11  ;;  %v823_v36 = vsub.f32 %v2146_v27, %v2159_v32 }
  0x41   :  { %1648 = vmatpush3.msra.mxu0 %v2107_v11  ;;  %1660 = vmatprep.subr.mxu1 %v789_v13  ;;  %v803_v25 = vand.u32 4294901760, %v802_v20  ;;  %v809_v26 = vsub.f32 %v2120_v16, %v2132_v21  ;;  %v2152_v29 = vand.u32 4294901760, %v2137_v23 }
  0x42   :  { %1661 = vmatpush3.msra.mxu1 %v789_v13  ;;  %1649 = vmatprep.subr.mxu0 %v2123_v17  ;;  %v824_v40 = vand.u32 4294901760, %v823_v36 }
  0x43   :  { %1662 = vmatprep.subr.mxu1 %v796_v19  ;;  %1650 = vmatpush3.msra.mxu0 %v2123_v17  ;;  %v810_v31 = vand.u32 4294901760, %v809_v26  ;;  %v816_v35 = vsub.f32 %v2137_v23, %v2152_v29 }
  0x44   :  { %1663 = vmatpush3.msra.mxu1 %v796_v19  ;;  %1651 = vmatprep.subr.mxu0 %v2134_v22 }
  0x45   :  { %1664 = vmatprep.subr.mxu1 %v803_v25  ;;  %1652 = vmatpush3.msra.mxu0 %v2134_v22  ;;  %v817_v39 = vand.u32 4294901760, %v816_v35 }
  0x46   :  { %1665 = vmatpush3.msra.mxu1 %v803_v25  ;;  %1653 = vmatprep.subr.mxu0 %v2148_v28 }
  0x47   :  { %1666 = vmatprep.subr.mxu1 %v810_v31  ;;  %1654 = vmatpush3.msra.mxu0 %v2148_v28 }
  0x48   :  { %1667 = vmatpush3.msra.mxu1 %v810_v31  ;;  %1655 = vmatprep.subr.mxu0 %v2164_v34 }
  0x49   :  { %1656 = vmatpush3.msra.mxu0 %v2164_v34  ;;  %1668 = vmatprep.subr.mxu1 %v817_v39 }
  0x4a   :  { %1679 = vmatprep.subr.mxu0 %v2077_v1  ;;  %1669 = vmatpush3.msra.mxu1 %v817_v39 }
  0x4b   :  { %1670 = vmatprep.subr.mxu1 %v824_v40 }
  0x4c   :  { %1671 = vmatpush3.msra.mxu1 %v824_v40 }
  0x4d   :  { %1672 = vmatprep.subr.mxu1 %v831_v43 }
  0x4e   :  { %1673 = vmatpush3.msra.mxu1 %v831_v43 }
  0x4f   :  { %1674 = vmatprep.subr.mxu1 %v838_v45 }
  0x50   :  { %1675 = vmatpush3.msra.mxu1 %v838_v45 }
  0x51   :  { %1698 = vmatprep.subr.mxu1 %v2071_v63 }
  0xd5   :  { %v1545_v46 = vpop.f32.mrf.mxu0 }
  0xd6   :  { %v144_v51 = vadd.f32 %v1545_v46, %v1403_v47 }
  0xd7   :  { %v133_v48 = vpop.f32.mrf.mxu0 }
  0xd8   :  { %v134_v53 = vadd.f32 %v1403_v47, %v133_v48 }
  0xdd   :  { %v1564_v49 = vpop.f32.mrf.mxu1 }
  0xde   :  { %v261_v56 = vadd.f32 %v1564_v49, %v144_v51 }
  0xdf   :  { %v254_v52 = vpop.f32.mrf.mxu1 }
  0xe0   :  { %v255_v58 = vadd.f32 %v254_v52, %v134_v53 }
  0xe6   :  { %v1583_v50 = vpop.f32.mrf.mxu0 }
  0xe7   :  { %v356_v59 = vadd.f32 %v1583_v50, %v261_v56 }
  0xe8   :  { %v348_v54 = vpop.f32.mrf.mxu0 }
  0xe9   :  { %v349_v61 = vadd.f32 %v348_v54, %v255_v58 }
  0xef   :  { %v1602_v55 = vpop.f32.mrf.mxu1 }
  0xf0   :  { %v445_v62 = vadd.f32 %v1602_v55, %v356_v59 }
  0xf1   :  { %v436_v60 = vpop.f32.mrf.mxu1 }
  0xf2   :  { %v437_v3 = vadd.f32 %v436_v60, %v349_v61 }
  0xf8   :  { %v1621_v57 = vpop.f32.mrf.mxu0 }
  0xf9   :  { %v546_v7 = vadd.f32 %v1621_v57, %v445_v62 }
  0xfa   :  { %v539_v0 = vpop.f32.mrf.mxu0 }
  0xfb   :  { %v540_v12 = vadd.f32 %v539_v0, %v437_v3 }
 0x100   :  { %v1640_v8 = vpop.f32.mrf.mxu1 }
 0x101   :  { %v631_v13 = vadd.f32 %v1640_v8, %v546_v7 }
 0x102   :  { %v624_v14 = vpop.f32.mrf.mxu1 }
 0x103   :  { %v635_v18 = vand.u32 2147483647, %v631_v13  ;;  %v625_v19 = vadd.f32 %v624_v14, %v540_v12  ;;  %vm649_vm1 = vcmp.ge.f32.partialorder %v631_v13, 0.0 }
 0x105   :  { %v637_v20 = vsub.f32 0.0, %v635_v18  ;;  %v634_v24 = vand.u32 2147483647, %v625_v19  ;;  %vm648_vm2 = vcmp.ge.f32.partialorder %v625_v19, 0.0 }
 0x107   :  { %v640_v25 = vmul.f32 1.442695, %v637_v20  ;;  %v636_v26 = vsub.f32 0.0, %v634_v24 }
 0x109   :  { %1760 = vpow2.f32 %v640_v25  ;;  %v638_v30 = vmul.f32 1.442695, %v636_v26 }
 0x10b   :  { %1762 = vpow2.f32 %v638_v30 }
 0x116   :  { %v1761_v31 = vpop.eup %1760 }
 0x117   :  { %v643_v35 = vadd.f32 1.0, %v1761_v31 }
 0x118   :  { %v1763_v36 = vpop.eup %1762 }
 0x119   :  { %1764 = vrcp.f32 %v643_v35  ;;  %v642_v39 = vadd.f32 1.0, %v1763_v36 }
 0x11b   :  { %1766 = vrcp.f32 %v642_v39 }
 0x126   :  { %v1765_v40 = vpop.eup %1764 }
 0x127   :  { %v651_v41 = vmul.f32 %v1765_v40, %v1761_v31 }
 0x128   :  { %v1767_v43 = vpop.eup %1766 }
 0x129   :  { %v653_v44 = vsel %vm649_vm1, %v1765_v40, %v651_v41  ;;  %v650_v45 = vmul.f32 %v1767_v43, %v1763_v36 }
 0x12a   :  { %v673_v46 = vsel %vm47_vm0, %v653_v44, 0 }
 0x12b   :  { %v2194_v47 = vand.u32 4294901760, %v673_v46  ;;  %v652_v48 = vsel %vm648_vm2, %v1767_v43, %v650_v45 }
 0x12c   :  { %v670_v49 = vsel %vm47_vm0, %v652_v48, 0 }
 0x12d   :  { %v759_v50 = vsub.f32 %v673_v46, %v2194_v47  ;;  %v748_v51 = vand.u32 4294901760, %v670_v49 }
 0x12f   :  { %v749_v52 = vsub.f32 %v670_v49, %v748_v51  ;;  %1676 = vmatprep.mubr.f32.mxu1 %v748_v51  ;;  %v760_v53 = vand.u32 4294901760, %v759_v50 }
 0x130   :  { %1677 = vmatmul.mubr.f32.vlgmr.msra.gmra.mxu1 %v2194_v47 }
 0x131   :  { %1699 = vmatpush3.msra.mxu1 %v2071_v63  ;;  %v750_v54 = vand.u32 4294901760, %v749_v52  ;;  %v761_v55 = vsub.f32 %v759_v50, %v760_v53 }
 0x132   :  { %1700 = vmatprep.subr.mxu1 %v2079_v2 }
 0x133   :  { %1701 = vmatpush3.msra.mxu1 %v2079_v2  ;;  %1714 = vmatprep.mubr.f32.mxu1 %v750_v54  ;;  %v751_v56 = vsub.f32 %v749_v52, %v750_v54  ;;  %v762_v58 = vand.u32 4294901760, %v761_v55 }
 0x134   :  { %1702 = vmatprep.subr.mxu1 %v2092_v6 }
 0x135   :  { %1703 = vmatpush3.msra.mxu1 %v2092_v6  ;;  %v752_v57 = vand.u32 4294901760, %v751_v56 }
 0x136   :  { %1704 = vmatprep.subr.mxu1 %v2107_v11 }
 0x137   :  { %1705 = vmatpush3.msra.mxu1 %v2107_v11  ;;  %1657 = vmatprep.mubr.f32.mxu0 %v752_v57 }
 0x138   :  { %1706 = vmatprep.subr.mxu1 %v2123_v17  ;;  %1658 = vmatmul.mubr.f32.vlgmr.msra.gmra.mxu0 %v762_v58 }
 0x139   :  { %1680 = vmatpush3.msra.mxu0 %v2077_v1  ;;  %1707 = vmatpush3.msra.mxu1 %v2123_v17  ;;  %v1308_v1 = vld [vmem:[%s2300_s7 + $0x8] sm:$0xff] }
 0x13a   :  { %1681 = vmatprep.subr.mxu0 %v2090_v5  ;;  %1695 = vmatprep.mubr.f32.mxu0 %v749_v52 }
 0x13b   :  { %1708 = vmatprep.subr.mxu1 %v2134_v22  ;;  %1682 = vmatpush3.msra.mxu0 %v2090_v5 }
 0x13c   :  { %1709 = vmatpush3.msra.mxu1 %v2134_v22  ;;  %1683 = vmatprep.subr.mxu0 %v2105_v10 }
 0x13d   :  { %1710 = vmatprep.subr.mxu1 %v2148_v28  ;;  %1684 = vmatpush3.msra.mxu0 %v2105_v10 }
 0x13e   :  { %1711 = vmatpush3.msra.mxu1 %v2148_v28  ;;  %1685 = vmatprep.subr.mxu0 %v2120_v16 }
 0x13f   :  { %1712 = vmatprep.subr.mxu1 %v2164_v34  ;;  %1686 = vmatpush3.msra.mxu0 %v2120_v16 }
 0x140   :  { %1713 = vmatpush3.msra.mxu1 %v2164_v34  ;;  %1687 = vmatprep.subr.mxu0 %v2137_v23 }
 0x141   :  { %1715 = vmatmul.mubr.f32.vlgmr.msra.gmra.mxu1 %v760_v53  ;;  %1736 = vmatprep.subr.mxu1 %v2071_v63 }
 0x142   :  { %1688 = vmatpush3.msra.mxu0 %v2137_v23  ;;  %1737 = vmatpush3.msra.mxu1 %v2071_v63  ;;  %v1307_v63 = vld [vmem:[%s2300_s7] sm:$0xff] }
 0x143   :  { %1752 = vmatprep.mubr.f32.mxu1 %v748_v51  ;;  %1689 = vmatprep.subr.mxu0 %v2146_v27 }
 0x144   :  { %1738 = vmatprep.subr.mxu1 %v2079_v2  ;;  %1690 = vmatpush3.msra.mxu0 %v2146_v27 }
 0x145   :  { %1739 = vmatpush3.msra.mxu1 %v2079_v2  ;;  %1691 = vmatprep.subr.mxu0 %v2162_v33 }
 0x146   :  { %1740 = vmatprep.subr.mxu1 %v2092_v6  ;;  %1692 = vmatpush3.msra.mxu0 %v2162_v33 }
 0x147   :  { %1741 = vmatpush3.msra.mxu1 %v2092_v6  ;;  %1693 = vmatprep.subr.mxu0 %v2176_v38 }
 0x148   :  { %1742 = vmatprep.subr.mxu1 %v2107_v11  ;;  %1694 = vmatpush3.msra.mxu0 %v2176_v38 }
 0x149   :  { %1743 = vmatpush3.msra.mxu1 %v2107_v11  ;;  %1696 = vmatmul.mubr.f32.vlgmr.msra.gmra.mxu0 %v759_v50 }
 0x14a   :  { %1717 = vmatprep.subr.mxu0 %v2087_v4  ;;  %1744 = vmatprep.subr.mxu1 %v2123_v17 }
 0x14b   :  { %1718 = vmatpush3.msra.mxu0 %v2087_v4  ;;  %1733 = vmatprep.mubr.f32.mxu0 %v748_v51  ;;  %v1404_v4 = vld [vmem:[%s2297_s4] ss:$0 sm:$0xff] }
 0x14c   :  { %1745 = vmatpush3.msra.mxu1 %v2123_v17  ;;  %1719 = vmatprep.subr.mxu0 %v2102_v9 }
 0x14d   :  { %1746 = vmatprep.subr.mxu1 %v2134_v22  ;;  %1720 = vmatpush3.msra.mxu0 %v2102_v9 }
 0x14e   :  { %1747 = vmatpush3.msra.mxu1 %v2134_v22  ;;  %1721 = vmatprep.subr.mxu0 %v2117_v15 }
 0x14f   :  { %1748 = vmatprep.subr.mxu1 %v2148_v28  ;;  %1722 = vmatpush3.msra.mxu0 %v2117_v15 }
 0x150   :  { %1749 = vmatpush3.msra.mxu1 %v2148_v28  ;;  %1723 = vmatprep.subr.mxu0 %v2132_v21 }
 0x151   :  { %1750 = vmatprep.subr.mxu1 %v2164_v34  ;;  %1724 = vmatpush3.msra.mxu0 %v2132_v21 }
 0x152   :  { %1751 = vmatpush3.msra.mxu1 %v2164_v34  ;;  %1725 = vmatprep.subr.mxu0 %v2152_v29 }
 0x153   :  { %1753 = vmatmul.mubr.f32.vlgmr.msra.gmra.mxu1 %v2194_v47  ;;  %1726 = vmatpush3.msra.mxu0 %v2152_v29 }
 0x154   :  { %1727 = vmatprep.subr.mxu0 %v2159_v32  ;;  %1345 = vrot.lane.b32.xlu0 %v1307_v63, %s1808_s19 }
 0x155   :  { %1728 = vmatpush3.msra.mxu0 %v2159_v32 }
 0x156   :  { %1729 = vmatprep.subr.mxu0 %v2173_v37 }
 0x157   :  { %1730 = vmatpush3.msra.mxu0 %v2173_v37 }
 0x158   :  { %1731 = vmatprep.subr.mxu0 %v2183_v42  ;;  %1347 = vrot.lane.b32.xlu0 %v1308_v1, %s1808_s19 }
 0x159   :  { %1732 = vmatpush3.msra.mxu0 %v2183_v42 }
 0x15a   :  { %1734 = vmatmul.mubr.f32.vlgmr.msra.gmra.mxu0 %v2194_v47 }
 0x1f0   :  { %v1678_v5 = vpop.f32.mrf.mxu1 }
 0x1f2   :  { %v875_v15 = vpop.f32.mrf.mxu1 }
 0x1f8   :  { %v1659_v2 = vpop.f32.mrf.mxu0 }
 0x1f9   :  { %v765_v9 = vadd.f32 %v1659_v2, %v1404_v4 }
 0x1fa   :  { %v754_v6 = vpop.f32.mrf.mxu0 }
 0x1fb   :  { %v755_v11 = vadd.f32 %v1404_v4, %v754_v6  ;;  %v882_v16 = vadd.f32 %v1678_v5, %v765_v9  ;;  %v1320_v9 = vlaneseq }
 0x1fd   :  { %v876_v23 = vadd.f32 %v875_v15, %v755_v11  ;;  %v1305_v11 = vld [vmem:[%s2298_s5] sm:$0x1]  ;;  %s1809_s5 = smov 112  }
 0x201   :  { %v1716_v17 = vpop.f32.mrf.mxu1 }
 0x203   :  { %v1057_v28 = vpop.f32.mrf.mxu1 }
 0x209   :  { %v1697_v10 = vpop.f32.mrf.mxu0 }
 0x20a   :  { %v977_v22 = vadd.f32 %v1697_v10, %v882_v16  ;;  %v1321_v10 = vshrl.u32 %v1320_v9, 7 }
 0x20b   :  { %v969_v21 = vpop.f32.mrf.mxu0 }
 0x20c   :  { %v970_v27 = vadd.f32 %v969_v21, %v876_v23  ;;  %v1066_v29 = vadd.f32 %v1716_v17, %v977_v22  ;;  %v1322_v15 = vsub.s32 0, %v1321_v10  ;;  %v1306_v22 = vld [vmem:[%s2299_s6] sm:$0x1]  ;;  %s1810_s6 = smov [#allocation2]  }
 0x20d   :  { %s1392_s1 = sshll.u32 %s1810_s6, 4  ;;  %s1393_s1 = int_to_ptr.vmem [resolvable:$true] %s1392_s1 }
 0x20e   :  { %v1058_v37 = vadd.f32 %v1057_v28, %v970_v27  ;;  %s1786_s25 = scalar_lea.vmem %s1393_s1, 256  ;;  %p1791_p1 = scmp.lt.s32.totalorder %s1393_s1, %s1393_s1 }
 0x20f   :  { %p1787_p0 = scmp.ne.s32.totalorder %s1393_s1, %s1786_s25  ;;  %p1792_p2 = scmp.lt.s32.totalorder %s1786_s25, %s1786_s25 }
 0x211   :  { %p1793_p3 = por %p1792_p2, %p1791_p1 }
 0x213   :  { %v1754_v32 = vpop.f32.mrf.mxu1  ;;  %p1794_p4 = pnand %p1793_p3, %p1787_p0 }
 0x215   :  { %v1245_v60 = vpop.f32.mrf.mxu1 }
 0x21a   :  { %v1735_v33 = vpop.f32.mrf.mxu0 }
 0x21b   :  { %v1167_v34 = vadd.f32 %v1735_v33, %v1066_v29 }
 0x21c   :  { %v1160_v38 = vpop.f32.mrf.mxu0 }
 0x21d   :  { %v1252_v42 = vadd.f32 %v1754_v32, %v1167_v34  ;;  %v1161_v59 = vadd.f32 %v1160_v38, %v1058_v37 }
 0x21f   :  { %v1256_v61 = vand.u32 2147483647, %v1252_v42  ;;  %v1246_v62 = vadd.f32 %v1245_v60, %v1161_v59  ;;  %vm1270_vm3 = vcmp.ge.f32.partialorder %v1252_v42, 0.0 }
 0x221   :  { %v1258_v0 = vsub.f32 0.0, %v1256_v61  ;;  %v1255_v3 = vand.u32 2147483647, %v1246_v62  ;;  %vm1269_vm4 = vcmp.ge.f32.partialorder %v1246_v62, 0.0 }
 0x223   :  { %v1261_v7 = vmul.f32 1.442695, %v1258_v0  ;;  %v1257_v8 = vsub.f32 0.0, %v1255_v3  ;;  %v1346_v0 = vpop.permute.xlu0 %1345 }
 0x225   :  { %1768 = vpow2.f32 %v1261_v7  ;;  %v1259_v12 = vmul.f32 1.442695, %v1257_v8 }
 0x227   :  { %1770 = vpow2.f32 %v1259_v12  ;;  %v1348_v12 = vpop.permute.xlu0 %1347 }
 0x232   :  { %v1769_v13 = vpop.eup %1768 }
 0x233   :  { %v1264_v14 = vadd.f32 1.0, %v1769_v13 }
 0x234   :  { %v1771_v18 = vpop.eup %1770 }
 0x235   :  { %1772 = vrcp.f32 %v1264_v14  ;;  %v1263_v19 = vadd.f32 1.0, %v1771_v18 }
 0x237   :  { %1774 = vrcp.f32 %v1263_v19 }
 0x242   :  { %v1773_v20 = vpop.eup %1772 }
 0x243   :  { %v1272_v24 = vmul.f32 %v1773_v20, %v1769_v13 }
 0x244   :  { %v1775_v25 = vpop.eup %1774 }
 0x245   :  { %v1274_v26 = vsel %vm1270_vm3, %v1773_v20, %v1272_v24  ;;  %v1271_v30 = vmul.f32 %v1775_v25, %v1771_v18 }
 0x246   :  { %v1406_v31 = vadd.f32 -0.5, %v1274_v26 }
 0x247   :  { %v1273_v35 = vsel %vm1269_vm4, %v1775_v25, %v1271_v30 }
 0x248   :  { %v1295_v36 = vmul.f32 %v1406_v31, %v1406_v31  ;;  %v1405_v39 = vadd.f32 -0.5, %v1273_v35  ;;  %v1286_v40 = vsel %vm1284_vm5, %v1406_v31, 0.0 }
 0x24a   :  { %v1285_v41 = vsel %vm1284_vm5, %v1405_v39, 0.0  ;;  %v1294_v43 = vmul.f32 %v1405_v39, %v1405_v39  ;;  %v1297_v45 = vsel %vm1284_vm5, %v1295_v36, 0.0 }
 0x24b   :  { %v1287_v44 = vadd.f32 %v1286_v40, %v1285_v41 }
 0x24c   :  { %v1296_v46 = vsel %vm1284_vm5, %v1294_v43, 0.0 }
 0x24d   :  { %v1288_v47 = vrot.slane %v1287_v44, 4  ;;  %v1298_v48 = vadd.f32 %v1297_v45, %v1296_v46 }
 0x24f   :  { %v1289_v49 = vadd.f32 %v1288_v47, %v1287_v44  ;;  %v1299_v50 = vrot.slane %v1298_v48, 4 }
 0x251   :  { %v1290_v51 = vrot.slane %v1289_v49, 2  ;;  %v1300_v52 = vadd.f32 %v1299_v50, %v1298_v48 }
 0x253   :  { %v1291_v53 = vadd.f32 %v1290_v51, %v1289_v49  ;;  %v1301_v54 = vrot.slane %v1300_v52, 2 }
 0x255   :  { %v1302_v55 = vadd.f32 %v1301_v54, %v1300_v52  ;;  %v1292_v56 = vrot.slane %v1291_v53, 1 }
 0x257   :  { %v1303_v57 = vrot.slane %v1302_v55, 1  ;;  %v1293_v58 = vadd.f32 %v1292_v56, %v1291_v53 }
 0x259   :  { %v1304_v63 = vadd.f32 %v1303_v57, %v1302_v55  ;;  %v1309_v1 = vmul.f32 0.0625, %v1293_v58 }
 0x25b   :  { %v1311_v2 = vmul.f32 0.0625, %v1304_v63  ;;  %v1312_v4 = vmul.f32 %v1309_v1, %v1309_v1  ;;  %v1310_v17 = vadd.f32 0.5, %v1309_v1 }
 0x25d   :  { %v1313_v5 = vsub.f32 %v1311_v2, %v1312_v4 }
 0x25f   :  { %v1314_v6 = vadd.f32 1e-05, %v1313_v5 }
 0x261   :  { %1776 = vrsqrt.f32 %v1314_v6 }
 0x26e   :  { %v1777_v16 = vpop.eup %1776 }
 0x26f   :  { %v1316_v21 = vmul.f32 %v1777_v16, %v1305_v11 }
 0x271   :  { %v1317_v23 = vmul.f32 %v1316_v21, %v1310_v17  ;;  %v1323_v27 = vrot.slane %v1316_v21, %v1322_v15 }
 0x273   :  { %v1318_v28 = vsub.f32 %v1306_v22, %v1317_v23  ;;  %v1326_v29 = vmul.f32 %v1323_v27, %v1274_v26  ;;  %v1325_v33 = vmul.f32 %v1323_v27, %v1273_v35 }
 0x275   :  { %v1331_v32 = vrot.slane %v1318_v28, %v1322_v15 }
 0x277   :  { %v1334_v34 = vadd.f32 %v1331_v32, %v1326_v29  ;;  %v1333_v37 = vadd.f32 %v1331_v32, %v1325_v33 }
 0x279   :  { %1367 = vrot.lane.b32.xlu1 %v1334_v34, %s1808_s19  ;;  %1778 = vtanh.f32 %v1334_v34  ;;  %1365 = vrot.lane.b32.xlu0 %v1333_v37, %s1808_s19 }
 0x27a   :  { %1780 = vtanh.f32 %v1333_v37 }
 0x286   :  { %v1779_v38 = vpop.eup %1778 }
 0x287   :  { %v1781_v42 = vpop.eup %1780  ;;  %v1338_v59 = vmul.f32 0.5, %v1779_v38 }
 0x288   :  { %1373 = vrot.lane.b32.xlu0 %v1781_v42, %s1808_s19  ;;  %v1337_v60 = vmul.f32 0.5, %v1781_v42 }
 0x289   :  { %v1341_v62 = vmul.f32 1.442695, %v1338_v59 }
 0x28a   :  { %v1339_v61 = vmul.f32 1.442695, %v1337_v60 }
 0x28c   :  { %1782 = vpow2.f32 %v1339_v61 }
 0x28d   :  { %1784 = vpow2.f32 %v1341_v62 }
 0x299   :  { %v1783_v3 = vpop.eup %1782 }
 0x29a   :  { %v1351_v7 = vmul.f32 %v1783_v3, %v1346_v0  ;;  %v1785_v8 = vpop.eup %1784 }
 0x29b   :  { %v1352_v13 = vmul.f32 %v1785_v8, %v1348_v12 }
 0x29c   :  { %1355 = vrot.lane.b32.xlu1 %v1351_v7, %s1809_s5 }
 0x2a0   :  { %1357 = vrot.lane.b32.xlu1 %v1352_v13, %s1809_s5 }
 0x2a4   :  { %1375 = vrot.lane.b32.xlu1 %v1779_v38, %s1808_s19 }
 0x2eb   :  { %v1368_v14 = vpop.permute.xlu1 %1367  ;;  %v1366_v18 = vpop.permute.xlu0 %1365 }
 0x2fa   :  { %v1374_v24 = vpop.permute.xlu0 %1373 }
 0x30e   :  { %v1356_v19 = vpop.permute.xlu1 %1355 }
 0x30f   :  { %v1361_v20 = vadd.f32 %v1356_v19, %v1333_v37 }
 0x311   :  { %v1380_v25 = vsel %vm1379_vm6, %v1361_v20, %v1366_v18 }
 0x312   :  { %v1358_v26 = vpop.permute.xlu1 %1357  ;;  %v1382_v30 = vsel %vm1284_vm5, %v1380_v25, %v1374_v24 }
 0x313   :  { %v1362_v31 = vadd.f32 %v1358_v26, %v1334_v34  ;;  %1385 = vst.msk [vmem:[#allocation2] sm:$0xff] %vm1384_vm7, %v1382_v30 }
 0x315   :  { %v1381_v35 = vsel %vm1379_vm6, %v1362_v31, %v1368_v14 }
 0x316   :  { %v1376_v36 = vpop.permute.xlu1 %1375 }
 0x317   :  { %v1383_v39 = vsel %vm1284_vm5, %v1381_v35, %v1376_v36 }
 0x318   :  { %1386 = vst.msk [vmem:[#allocation2 + $0x8] sm:$0xff] %vm1384_vm7, %v1383_v39 }
 0x319   :  { %1797 = shalt.err (!%p1794_p4)
}
 0x31a   :  { %s1811_s26 = smov 128   ;;  %s1812_s27 = smov 8  }
 0x31b   :  { %1398 = dma.vmem_to_hbm [thread:$0]  %s1393_s1, 256, %s2301_s8, [#allocation3], %s1811_s26, %s1811_s26, %s1812_s27  }
 0x31c   :  { %1806 = dma.done.wait [#allocation3], 256  }
 0x31d   :  { %1807 = vsyncadd [#allocation3], 4294967040 }
 0x31e   :  { %1402 = vsyncpa [#allocation3], 1 }

</bundles_post_ra>
